<compile_context>
chip_gen: v6e
topology: v6e:2x2x1
jax: 0.10.0
libtpu: 0.0.40
codegen_flags: <defaults>
</compile_context>

<pallas_src>
import functools
import math

import numpy as np
import jax
import jax.numpy as jnp
from jax.experimental import pallas as pl
from jax.experimental.pallas import tpu as pltpu


# ----------------------------------------------------------------------------
# Pallas kernels
# ----------------------------------------------------------------------------
def linear_kernel(x_ref, w_ref, b_ref, o_ref):
    """y = x @ W.T + b  with torch-layout W (Dout, Din).

    x block: (tm, Din), W block: (Dout, Din), b: (1, Dout).
    bf16 MXU operands, f32 accumulation, f32 bias add.
    """
    x = x_ref[...].astype(jnp.bfloat16)
    w = w_ref[...].astype(jnp.bfloat16)
    acc = jax.lax.dot_general(
        x, w, (((1,), (1,)), ((), ())),
        preferred_element_type=jnp.float32)           # (tm, Dout)
    o_ref[...] = (acc + b_ref[...]).astype(o_ref.dtype)


def attn_kernel(cos_q_ref, sin_q_ref, cos_k_ref, sin_k_ref, p_ref,
                q_ref, k_ref, v_ref, o_ref, *, num_heads, head_dim):
    """One batch element, all heads: rotary + softmax attention.

    q/k/v blocks: (1, L, dim) with dim = num_heads*head_dim on the lane axis.
    cos/sin tables: (L, dim), already tiled per-head (cos=1, sin=0 on the
    un-rotated channels).  p_ref: (dim, dim) block-diagonal permutation matrix
    implementing the per-head interleaved-pair rotate_half via x @ P.
    """
    q = q_ref[0].astype(jnp.float32)            # (Lq, dim)
    k = k_ref[0].astype(jnp.float32)            # (Lk, dim)
    v = v_ref[0]                                # (Lk, dim)
    P = p_ref[...]                              # (dim, dim) f32

    # Partial rotary embedding, f32 (torch.autocast disabled in the module),
    # applied lane-dense on the full (L, dim) tile for all heads at once.
    qr = q * cos_q_ref[...] + jnp.dot(
        q, P, preferred_element_type=jnp.float32) * sin_q_ref[...]
    kr = k * cos_k_ref[...] + jnp.dot(
        k, P, preferred_element_type=jnp.float32) * sin_k_ref[...]

    scale = 1.0 / math.sqrt(head_dim)
    q_b = (qr * scale).astype(jnp.bfloat16)
    k_b = kr.astype(jnp.bfloat16)
    v_b = v.astype(jnp.bfloat16)

    outs = []
    for h in range(num_heads):                  # static unroll over heads
        lo = h * head_dim
        hi = lo + head_dim
        s = jax.lax.dot_general(                # (Lq, Lk), f32 accumulation
            q_b[:, lo:hi], k_b[:, lo:hi],
            (((1,), (1,)), ((), ())),
            preferred_element_type=jnp.float32)
        # numerically-stable softmax over keys (f32 on VPU/EUP)
        m = jnp.max(s, axis=-1, keepdims=True)
        e = jnp.exp(s - m)
        denom = jnp.sum(e, axis=-1, keepdims=True)
        p = e * pl.reciprocal(denom, approx=True)
        outs.append(jnp.dot(p.astype(jnp.bfloat16), v_b[:, lo:hi],
                            preferred_element_type=jnp.float32))
    # lane-dense store: (Lq, dim)
    o_ref[0] = jnp.concatenate(outs, axis=-1).astype(o_ref.dtype)


# ----------------------------------------------------------------------------
# Wrappers
# ----------------------------------------------------------------------------
def _row_tile(M):
    for t in (512, 256, 128):
        if M % t == 0:
            return t
    return M


def pallas_linear(x2d, W, b, out_dtype=jnp.float32):
    """x2d: (M, Din), W: (Dout, Din) torch layout, b: (Dout,)."""
    M, Din = x2d.shape
    Dout = W.shape[0]
    tm = _row_tile(M)
    return pl.pallas_call(
        linear_kernel,
        out_shape=jax.ShapeDtypeStruct((M, Dout), out_dtype),
        grid_spec=pltpu.PrefetchScalarGridSpec(
            num_scalar_prefetch=0,
            grid=(M // tm,),
            in_specs=[
                pl.BlockSpec((tm, Din), lambda i: (i, 0)),     # x rows
                pl.BlockSpec((Dout, Din), lambda i: (0, 0)),   # W (resident)
                pl.BlockSpec((1, Dout), lambda i: (0, 0)),     # bias
            ],
            out_specs=pl.BlockSpec((tm, Dout), lambda i: (i, 0)),
        ),
        compiler_params=pltpu.CompilerParams(
            dimension_semantics=("parallel",)),
        cost_estimate=pl.CostEstimate(
            flops=int(2 * M * Din * Dout),
            transcendentals=0,
            bytes_accessed=int(4 * (M * Din + Din * Dout + Dout + M * Dout))),
    )(x2d, W, b.reshape(1, Dout))


def rotary_tables(L, head_dim, theta=10000.0):
    """Per-head cos/sin tables (L, head_dim); identity on channels >= rot."""
    rot = head_dim // 2
    freqs = 1.0 / (theta ** (jnp.arange(0, rot, 2, dtype=jnp.float32) / rot))
    ang = jnp.arange(L, dtype=jnp.float32)[:, None] * freqs[None, :]  # (L, rot//2)
    ang = jnp.repeat(ang, 2, axis=-1)                                  # (L, rot)
    cos = jnp.concatenate(
        [jnp.cos(ang), jnp.ones((L, head_dim - rot), jnp.float32)], axis=-1)
    sin = jnp.concatenate(
        [jnp.sin(ang), jnp.zeros((L, head_dim - rot), jnp.float32)], axis=-1)
    return cos, sin


def rotate_half_matrix(dim, num_heads, head_dim):
    """Block-diagonal P s.t. (x @ P) == rotate_half(x) per head on the
    rotated (interleaved-pair) channels, 0 elsewhere."""
    rot = head_dim // 2
    P = np.zeros((dim, dim), np.float32)
    for h in range(num_heads):
        base = h * head_dim
        for i in range(rot // 2):
            P[base + 2 * i + 1, base + 2 * i] = -1.0   # out[2i]   = -x[2i+1]
            P[base + 2 * i, base + 2 * i + 1] = 1.0    # out[2i+1] =  x[2i]
    return jnp.asarray(P)


def multi_head_cross_attention(q_in, k_in, v_in, params, num_heads):
    """Pallas implementation of MultiHeadCrossAttention.forward
    (attn_mask=None, rotary_pos_emb=True)."""
    B, Lq, dim = q_in.shape
    Lk = k_in.shape[1]
    H = num_heads
    hd = dim // H

    # QKV projections (bf16 intermediates; channels stay interleaved per head,
    # no head transpose through HBM)
    q = pallas_linear(q_in.reshape(B * Lq, dim), params["Wq"], params["bq"],
                      out_dtype=jnp.bfloat16).reshape(B, Lq, dim)
    k = pallas_linear(k_in.reshape(B * Lk, dim), params["Wk"], params["bk"],
                      out_dtype=jnp.bfloat16).reshape(B, Lk, dim)
    v = pallas_linear(v_in.reshape(B * Lk, dim), params["Wv"], params["bv"],
                      out_dtype=jnp.bfloat16).reshape(B, Lk, dim)

    # rotary tables tiled across heads -> lane-dense (L, dim) application
    cos_q, sin_q = rotary_tables(Lq, hd)
    cos_k, sin_k = rotary_tables(Lk, hd)
    cos_q, sin_q = jnp.tile(cos_q, (1, H)), jnp.tile(sin_q, (1, H))
    cos_k, sin_k = jnp.tile(cos_k, (1, H)), jnp.tile(sin_k, (1, H))
    P = rotate_half_matrix(dim, H, hd)

    attn_out = pl.pallas_call(
        functools.partial(attn_kernel, num_heads=H, head_dim=hd),
        out_shape=jax.ShapeDtypeStruct((B, Lq, dim), jnp.bfloat16),
        grid_spec=pltpu.PrefetchScalarGridSpec(
            num_scalar_prefetch=0,
            grid=(B,),
            in_specs=[
                pl.BlockSpec((Lq, dim), lambda b: (0, 0)),        # cos_q
                pl.BlockSpec((Lq, dim), lambda b: (0, 0)),        # sin_q
                pl.BlockSpec((Lk, dim), lambda b: (0, 0)),        # cos_k
                pl.BlockSpec((Lk, dim), lambda b: (0, 0)),        # sin_k
                pl.BlockSpec((dim, dim), lambda b: (0, 0)),       # P
                pl.BlockSpec((1, Lq, dim), lambda b: (b, 0, 0)),  # q
                pl.BlockSpec((1, Lk, dim), lambda b: (b, 0, 0)),  # k
                pl.BlockSpec((1, Lk, dim), lambda b: (b, 0, 0)),  # v
            ],
            out_specs=pl.BlockSpec((1, Lq, dim), lambda b: (b, 0, 0)),
        ),
        compiler_params=pltpu.CompilerParams(
            dimension_semantics=("parallel",)),
        cost_estimate=pl.CostEstimate(
            flops=int(2 * B * dim * dim * (Lq + Lk)        # rotary matmuls
                      + 4 * B * H * Lq * Lk * hd),         # scores + attn@v
            transcendentals=int(B * H * Lq * Lk),
            bytes_accessed=int(2 * B * (Lq + 2 * Lk) * dim     # bf16 q,k,v
                               + 2 * B * Lq * dim              # bf16 out
                               + 4 * 2 * (Lq + Lk) * dim       # cos/sin
                               + 4 * dim * dim)),              # P
    )(cos_q, sin_q, cos_k, sin_k, P, q, k, v)

    # output projection (f32 result)
    out = pallas_linear(attn_out.reshape(B * Lq, dim),
                        params["Wo"], params["bo"], out_dtype=jnp.float32)
    return out.reshape(B, Lq, dim)


# ----------------------------------------------------------------------------
# Pure-JAX reference (mirrors the PyTorch forward semantics, full f32)
# ----------------------------------------------------------------------------
def reference(q_in, k_in, v_in, params, num_heads):
    B, Lq, dim = q_in.shape
    Lk = k_in.shape[1]
    H = num_heads
    hd = dim // H

    def lin(x, W, b):
        return x @ W.T + b

    q = lin(q_in, params["Wq"], params["bq"]).reshape(B, Lq, H, hd).transpose(0, 2, 1, 3)
    k = lin(k_in, params["Wk"], params["bk"]).reshape(B, Lk, H, hd).transpose(0, 2, 1, 3)
    v = lin(v_in, params["Wv"], params["bv"]).reshape(B, Lk, H, hd).transpose(0, 2, 1, 3)

    def rotate(x, L):
        rot = hd // 2
        freqs = 1.0 / (10000.0 ** (jnp.arange(0, rot, 2, dtype=jnp.float32) / rot))
        ang = jnp.arange(L, dtype=jnp.float32)[:, None] * freqs[None, :]
        cos = jnp.repeat(jnp.cos(ang), 2, axis=-1)
        sin = jnp.repeat(jnp.sin(ang), 2, axis=-1)
        xl, xr = x[..., :rot], x[..., rot:]
        pairs = xl.reshape(*xl.shape[:-1], rot // 2, 2)
        rh = jnp.stack([-pairs[..., 1], pairs[..., 0]], axis=-1).reshape(xl.shape)
        return jnp.concatenate([xl * cos + rh * sin, xr], axis=-1)

    q = rotate(q, Lq)
    k = rotate(k, Lk)

    s = jnp.einsum("bhqd,bhkd->bhqk", q, k) / math.sqrt(hd)
    p = jax.nn.softmax(s, axis=-1)
    o = jnp.einsum("bhqk,bhkd->bhqd", p, v)
    o = o.transpose(0, 2, 1, 3).reshape(B, Lq, dim)
    return lin(o, params["Wo"], params["bo"])


# ----------------------------------------------------------------------------
if __name__ == "__main__":
    B, Lq, Lk = 2, 16, 16
    dim, num_heads = 32, 4

    key = jax.random.PRNGKey(0)
    ks = jax.random.split(key, 12)
    scale = 1.0 / math.sqrt(dim)
    params = {
        "Wq": jax.random.normal(ks[0], (dim, dim), jnp.float32) * scale,
        "bq": jax.random.normal(ks[1], (dim,), jnp.float32) * scale,
        "Wk": jax.random.normal(ks[2], (dim, dim), jnp.float32) * scale,
        "bk": jax.random.normal(ks[3], (dim,), jnp.float32) * scale,
        "Wv": jax.random.normal(ks[4], (dim, dim), jnp.float32) * scale,
        "bv": jax.random.normal(ks[5], (dim,), jnp.float32) * scale,
        "Wo": jax.random.normal(ks[6], (dim, dim), jnp.float32) * scale,
        "bo": jax.random.normal(ks[7], (dim,), jnp.float32) * scale,
    }

    q_in = jax.random.normal(ks[8], (B, Lq, dim), jnp.float32)
    k_in = jax.random.normal(ks[9], (B, Lk, dim), jnp.float32)
    v_in = jax.random.normal(ks[10], (B, Lk, dim), jnp.float32)

    out = multi_head_cross_attention(q_in, k_in, v_in, params, num_heads)
    out = jax.block_until_ready(out)

    ref = jax.block_until_ready(reference(q_in, k_in, v_in, params, num_heads))
    # bf16 MXU operands + approx reciprocal -> slightly looser tolerance
    np.testing.assert_allclose(np.asarray(out), np.asarray(ref),
                               rtol=3e-2, atol=3e-2)

    print("KERNEL_OK")
</pallas_src>

<mosaic_0001>
module attributes {stable_mosaic.version = 11 : i64} {
  func.func @linear_kernel(%arg0: i32, %arg1: memref<32x32xf32, #tpu.memory_space<vmem>>, %arg2: memref<32x32xf32, #tpu.memory_space<vmem>>, %arg3: memref<1x32xf32, #tpu.memory_space<vmem>>, %arg4: memref<32x32xbf16, #tpu.memory_space<vmem>>) attributes {dimension_semantics = [#tpu.dimension_semantics<parallel>], iteration_bounds = array<i64: 1>, scalar_prefetch = 0 : i64, scratch_operands = 0 : i64, tpu.core_type = #tpu.core_type<tc>, window_params = [{transform_indices = @transform_0, window_bounds = array<i64: 32, 32>}, {pipeline_mode = #tpu.pipeline_mode<synchronous>, transform_indices = @transform_1, window_bounds = array<i64: 32, 32>}, {pipeline_mode = #tpu.pipeline_mode<synchronous>, transform_indices = @transform_2, window_bounds = array<i64: 1, 32>}, {transform_indices = @transform_3, window_bounds = array<i64: 32, 32>}]} {
    %c0 = arith.constant 0 : index
    %c0_0 = arith.constant 0 : index
    %0 = vector.load %arg1[%c0, %c0_0] : memref<32x32xf32, #tpu.memory_space<vmem>>, vector<32x32xf32>
    %1 = arith.truncf %0 : vector<32x32xf32> to vector<32x32xbf16>
    %c0_1 = arith.constant 0 : index
    %c0_2 = arith.constant 0 : index
    %2 = vector.load %arg2[%c0_1, %c0_2] : memref<32x32xf32, #tpu.memory_space<vmem>>, vector<32x32xf32>
    %3 = arith.truncf %2 : vector<32x32xf32> to vector<32x32xbf16>
    %cst = arith.constant dense<0.000000e+00> : vector<32x32xf32>
    %4 = tpu.matmul %1, %3, %cst {dimension_numbers = #tpu.dot_dimension_numbers<[1], [1], [0], [0], [0, 0, 1, 0], [], []>} : vector<32x32xbf16>, vector<32x32xbf16>, vector<32x32xf32> -> vector<32x32xf32>
    %c0_3 = arith.constant 0 : index
    %c0_4 = arith.constant 0 : index
    %5 = vector.load %arg3[%c0_3, %c0_4] : memref<1x32xf32, #tpu.memory_space<vmem>>, vector<1x32xf32>
    %6 = vector.broadcast %5 : vector<1x32xf32> to vector<32x32xf32>
    %7 = arith.addf %4, %6 : vector<32x32xf32>
    %8 = arith.truncf %7 : vector<32x32xf32> to vector<32x32xbf16>
    %c0_5 = arith.constant 0 : index
    %c0_6 = arith.constant 0 : index
    %9 = vector.load %arg4[%c0_5, %c0_6] : memref<32x32xbf16, #tpu.memory_space<vmem>>, vector<32x32xbf16>
    tpu.vector_store %arg4[%c0_5, %c0_6], %8 {strides = array<i32>} : memref<32x32xbf16, #tpu.memory_space<vmem>>, vector<32x32xbf16>,
    return
  }
  func.func @transform_0(%arg0: i32) -> (i32, i32) {
    %c0_i32 = arith.constant 0 : i32
    %c0_i32_0 = arith.constant 0 : i32
    return %arg0, %c0_i32 : i32, i32
  }
  func.func @transform_1(%arg0: i32) -> (i32, i32) {
    %c0_i32 = arith.constant 0 : i32
    %c0_i32_0 = arith.constant 0 : i32
    %c0_i32_1 = arith.constant 0 : i32
    return %c0_i32, %c0_i32_0 : i32, i32
  }
  func.func @transform_2(%arg0: i32) -> (i32, i32) {
    %c0_i32 = arith.constant 0 : i32
    %c0_i32_0 = arith.constant 0 : i32
    %c0_i32_1 = arith.constant 0 : i32
    return %c0_i32, %c0_i32_0 : i32, i32
  }
  func.func @transform_3(%arg0: i32) -> (i32, i32) {
    %c0_i32 = arith.constant 0 : i32
    %c0_i32_0 = arith.constant 0 : i32
    return %arg0, %c0_i32 : i32, i32
  }
}

</mosaic_0001>

<bundles_post_ra>
// kernel: tpu_custom_call.1
= control target key start
LH: loop header
LB: loop body
LE: loop exit
PB: predicated region body
PF: predicated region fallthrough
CT: control target
= control target key end

     0   :  { %8 = vsyncpa [#allocation3], 0  ;;  %s311_s0 = inlined_call_operand.hbm [shape: f32[32,32], index: 0, kind: input, shape index: {}]   ;;  %s312_s1 = inlined_call_operand.hbm [shape: f32[32,32], index: 1, kind: input, shape index: {}]   ;;  %s313_s2 = inlined_call_operand.vmem [shape: f32[1,32], index: 2, kind: input, shape index: {}]   ;;  %s314_s3 = inlined_call_operand.hbm [shape: bf16[32,32], index: 3, kind: output, shape index: {}]  }
   0x1   :  { %9 = vsyncpa [#allocation6], 0 }
   0x2   :  { %10 = vsyncpa [#allocation4], 0  ;;  %s262_s12 = smov [#allocation2]  }
   0x3   :  { %s16_s13 = sshll.u32 %s262_s12, 4  ;;  %s17_s13 = int_to_ptr.vmem [resolvable:$true] %s16_s13 }
   0x4   :  { %s204_s14 = scalar_lea.vmem %s17_s13, 512  ;;  %p209_p1 = scmp.lt.s32.totalorder %s17_s13, %s17_s13 }
   0x5   :  { %p205_p0 = scmp.ne.s32.totalorder %s17_s13, %s204_s14  ;;  %p210_p2 = scmp.lt.s32.totalorder %s204_s14, %s204_s14 }
   0x7   :  { %p211_p3 = por %p210_p2, %p209_p1 }
   0x9   :  { %p212_p4 = pnand %p211_p3, %p205_p0 }
   0xb   :  { %215 = shalt.err (!%p212_p4)
}
   0xc   :  { %s263_s15 = smov 128   ;;  %s264_s16 = smov 8  }
   0xd   :  { %22 = dma.hbm_to_vmem [thread:$0]  %s311_s0, 512, %s17_s13, [#allocation3], %s263_s15, %s263_s15, %s264_s16  }
   0xe   :  { %s265_s19 = smov [#allocation5]  }
   0xf   :  { %s28_s20 = sshll.u32 %s265_s19, 4  ;;  %s29_s20 = int_to_ptr.vmem [resolvable:$true] %s28_s20 }
  0x10   :  { %s224_s21 = scalar_lea.vmem %s29_s20, 512  ;;  %p229_p6 = scmp.lt.s32.totalorder %s29_s20, %s29_s20 }
  0x11   :  { %p225_p5 = scmp.ne.s32.totalorder %s29_s20, %s224_s21  ;;  %p230_p7 = scmp.lt.s32.totalorder %s224_s21, %s224_s21 }
  0x13   :  { %p231_p8 = por %p230_p7, %p229_p6 }
  0x15   :  { %p232_p9 = pnand %p231_p8, %p225_p5 }
  0x17   :  { %235 = shalt.err (!%p232_p9)
}
  0x18   :  { %34 = dma.hbm_to_vmem [thread:$0]  %s312_s1, 512, %s29_s20, [#allocation6], %s263_s15, %s263_s15, %s264_s16  }
  0x19   :  { %256 = dma.done.wait [#allocation3], 512  }
  0x1a   :  { %257 = vsyncadd [#allocation3], 4294966784 }
  0x1b   :  { %258 = dma.done.wait [#allocation6], 512  }
  0x1c   :  { %259 = vsyncadd [#allocation6], 4294966784  ;;  %v52_v0 = vld [vmem:[#allocation5 + $0x10] sm:$0xff]  ;;  %v53_v1 = vld [vmem:[#allocation5 + $0x18] sm:$0xff]  ;;  %vm63_vm0 = vcmask 261120   ;;  %vm141_vm1 = vcmask 257024  }
  0x1d   :  { %v50_v2 = vld [vmem:[#allocation5] sm:$0xff]  ;;  %v55_v3 = vpack.c.bf16 %v53_v1, %v52_v0  ;;  %v51_v4 = vld [vmem:[#allocation5 + $0x8] sm:$0xff]  ;;  %v46_v11 = vld [vmem:[#allocation2 + $0x10] sm:$0xff]  ;;  %s266_s24 = smov [#allocation7]  }
  0x1e   :  { %v44_v5 = vld [vmem:[#allocation2] sm:$0xff]  ;;  %v45_v6 = vld [vmem:[#allocation2 + $0x8] sm:$0xff]  ;;  %v54_v7 = vpack.c.bf16 %v51_v4, %v50_v2  ;;  %v47_v12 = vld [vmem:[#allocation2 + $0x18] sm:$0xff]  ;;  %s151_s25 = sshll.u32 %s266_s24, 4  ;;  %s152_s25 = int_to_ptr.vmem [resolvable:$true] %s151_s25 }
  0x1f   :  { %v48_v8 = vpack.c.bf16 %v45_v6, %v44_v5  ;;  %187 = vmatprep.subr.msk.bf16.mxu0 %vm63_vm0, %v55_v3  ;;  %v74_v9 = vsel %vm63_vm0, %v55_v3, 0  ;;  %v49_v13 = vpack.c.bf16 %v47_v12, %v46_v11  ;;  %v164_v14 = vld [vmem:[%s313_s2] ss:$0 sm:$0xff]  ;;  %s236_s2 = scalar_lea.vmem %s152_s25, 256  ;;  %p241_p11 = scmp.lt.s32.totalorder %s152_s25, %s152_s25 }
  0x20   :  { %180 = vmatpush3.bf16.xpose.msra.mxu0 %v74_v9  ;;  %v71_v10 = vsel %vm63_vm0, %v54_v7, 0  ;;  %p237_p10 = scmp.ne.s32.totalorder %s152_s25, %s236_s2  ;;  %p242_p12 = scmp.lt.s32.totalorder %s236_s2, %s236_s2 }
  0x21   :  { %183 = vmatprep.mubr.msk.bf16.mxu0 %vm63_vm0, %v48_v8  ;;  %188 = vmatprep.subr.msk.bf16.mxu0 %vm63_vm0, %v54_v7 }
  0x22   :  { %p243_p13 = por %p242_p12, %p241_p11 }
  0x24   :  { %p244_p0 = pnand %p243_p13, %p237_p10 }
  0x28   :  { %182 = vmatpush3.bf16.xpose.msra.mxu0 %v71_v10 }
  0x2f   :  { %184 = vmatmul.mubr.msk.bf16.vlgmr.msra.gmra.mxu0 %vm63_vm0, %v49_v13 }
  0xef   :  { %v185_v15 = vpop.f32.mrf.mxu0 }
  0xf0   :  { %v119_v16 = vadd.f32 %v185_v15, %v164_v14 }
  0xf1   :  { %v110_v17 = vpop.f32.mrf.mxu0 }
  0xf2   :  { %v173_v18 = vpack.c.bf16 %v119_v16, %v119_v16  ;;  %v111_v19 = vadd.f32 %v164_v14, %v110_v17 }
  0xf3   :  { %v186_v20 = vpop.f32.mrf.mxu0 }
  0xf4   :  { %144 = vst.msk [vmem:[#allocation7 + $0x8] sm:$0xf] %vm141_vm1, %v173_v18  ;;  %v171_v21 = vpack.c.bf16 %v111_v19, %v111_v19  ;;  %v122_v22 = vadd.f32 %v186_v20, %v164_v14 }
  0xf5   :  { %v113_v23 = vpop.f32.mrf.mxu0 }
  0xf6   :  { %142 = vst.msk [vmem:[#allocation7] sm:$0xf] %vm141_vm1, %v171_v21  ;;  %v174_v24 = vpack.c.bf16 %v122_v22, %v122_v22  ;;  %v114_v25 = vadd.f32 %v164_v14, %v113_v23 }
  0xf8   :  { %145 = vst.msk [vmem:[#allocation7 + $0xc] sm:$0xf] %vm141_vm1, %v174_v24  ;;  %v172_v26 = vpack.c.bf16 %v114_v25, %v114_v25 }
  0xfa   :  { %143 = vst.msk [vmem:[#allocation7 + $0x4] sm:$0xf] %vm141_vm1, %v172_v26 }
  0xfb   :  { %247 = shalt.err (!%p244_p0)
}
  0xfc   :  { %s267_s26 = smov 64   ;;  %s268_s27 = smov 4  }
  0xfd   :  { %157 = dma.vmem_to_hbm [thread:$0]  %s152_s25, 256, %s314_s3, [#allocation4], %s267_s26, %s267_s26, %s268_s27  }
  0xfe   :  { %260 = dma.done.wait [#allocation4], 256  }
  0xff   :  { %261 = vsyncadd [#allocation4], 4294967040 }
 0x100   :  { %161 = vsyncpa [#allocation3], 1 }
 0x101   :  { %162 = vsyncpa [#allocation6], 1 }
 0x102   :  { %163 = vsyncpa [#allocation4], 1 }

</bundles_post_ra>
